<compile_context>
chip_gen: v6e
topology: v6e:2x2x1
jax: 0.10.0
libtpu: 0.0.40
codegen_flags: <defaults>
</compile_context>

<pallas_src>
import math
import jax
import jax.numpy as jnp
from jax.experimental import pallas as pl
from jax.experimental.pallas import tpu as pltpu

EPS = 1e-5
LANE = 128      # vreg lane width; every feature dim is zero-padded to this
B_TILE = 1024   # batch tile for the large-batch grid path


def _pad_to(n, m):
    return ((n + m - 1) // m) * m


# ----------------------------- Pallas kernel ------------------------------- #

def make_fused_kernel(n_layers):
    """Fused kernel: n_layers x (dot + folded-BN bias + ReLU), then classifier.

    Ref layout:
      x_ref : [Bt, P]          lane-padded activations
      w_ref : [L+1, P, P]      packed folded weights (last entry = classifier)
      b_ref : [L+1, P]         packed folded biases  (last entry = classifier)
      o_ref : [Bt, P]          lane-dense logits (cols >= n_classes are 0)
    """
    def kernel(x_ref, w_ref, b_ref, o_ref):
        h = x_ref[...].astype(jnp.float32)
        for i in range(n_layers):                       # unrolled at trace time
            w = w_ref[i]                                # [P, P] static slice
            b = b_ref[i:i + 1, :]                       # [1, P] static slice
            h = jnp.maximum(
                jnp.dot(h, w, preferred_element_type=jnp.float32) + b, 0.0)
        wc = w_ref[n_layers]
        bc = b_ref[n_layers:n_layers + 1, :]
        logits = jnp.dot(h, wc, preferred_element_type=jnp.float32) + bc
        o_ref[...] = logits.astype(o_ref.dtype)

    return kernel


# ------------------------------ Wrapper ------------------------------------ #

def sparse_cell_forward(x, params, n_classes=2):
    """Single fused pallas_call for the whole SparseCell forward (eval mode)."""
    w_slab = params["w_slab"]          # [L+1, P, P]
    b_slab = params["b_slab"]          # [L+1, P]
    n_layers = w_slab.shape[0] - 1
    P = w_slab.shape[-1]
    B, F0 = x.shape

    # Lane-pad input features; zero columns feed zero weight rows -> exact.
    if F0 != P:
        x_pad = jnp.zeros((B, P), x.dtype).at[:, :F0].set(x)
    else:
        x_pad = x

    kernel = make_fused_kernel(n_layers)

    if B <= B_TILE:
        # Latency-bound regime: no grid, 3 whole-array VMEM operands (3 DMAs),
        # lane-dense [B, 128] output store.
        out_pad = pl.pallas_call(
            kernel,
            out_shape=jax.ShapeDtypeStruct((B, P), jnp.float32),
        )(x_pad, w_slab, b_slab)
        return out_pad[:, :n_classes]

    # Large-batch path: batch grid axis, weight/bias slabs VMEM-resident
    # (constant index_map), activation tiles auto double-buffered.
    Bp = _pad_to(B, B_TILE)
    if Bp != B:
        x_pad = jnp.zeros((Bp, P), x_pad.dtype).at[:B].set(x_pad)
    out_pad = pl.pallas_call(
        kernel,
        out_shape=jax.ShapeDtypeStruct((Bp, P), jnp.float32),
        grid=(Bp // B_TILE,),
        in_specs=[
            pl.BlockSpec((B_TILE, P), lambda i: (i, 0)),
            pl.BlockSpec(tuple(w_slab.shape), lambda i: (0, 0, 0)),
            pl.BlockSpec(tuple(b_slab.shape), lambda i: (0, 0)),
        ],
        out_specs=pl.BlockSpec((B_TILE, P), lambda i: (i, 0)),
        compiler_params=pltpu.CompilerParams(
            dimension_semantics=("parallel",)),   # shards tiles across v7x's 2 TCs
    )(x_pad, w_slab, b_slab)
    return out_pad[:B, :n_classes]


# ------------------------- Parameter construction -------------------------- #

def kaiming_uniform(key, shape, fan_in, a=math.sqrt(5)):
    # PyTorch kaiming_uniform_ with a=sqrt(5): bound = sqrt(6/((1+a^2)*fan_in))
    gain = math.sqrt(2.0 / (1.0 + a * a))
    bound = gain * math.sqrt(3.0 / fan_in)
    return jax.random.uniform(key, shape, jnp.float32, -bound, bound)


def build_params(key, map_shapes, n_classes=2):
    """map_shapes: list of (in_dim, out_dim) like the PyTorch adj matrices.

    Builds folded (eval-BN) weights/biases, zero-pads every feature dim to the
    common lane-padded width P, and packs everything into two slabs:
      w_slab [L+1, P, P], b_slab [L+1, P]   (last entry = classifier).
    """
    dims = [map_shapes[0][0]] + [d for (_, d) in map_shapes] + [n_classes]
    P = max(_pad_to(d, LANE) for d in dims)

    layers = []
    w_blocks, b_blocks = [], []
    for (din, dout) in map_shapes:
        key, k_adj, k_w, k_b = jax.random.split(key, 4)
        adj = (jax.random.uniform(k_adj, (din, dout)) > 0.5).astype(jnp.float32)
        # SparseLinear.weight has shape adj.T.shape = (dout, din); fan_in = din
        weight = kaiming_uniform(k_w, (dout, din), fan_in=din)
        bound = 1.0 / math.sqrt(din)
        bias = jax.random.uniform(k_b, (dout,), jnp.float32, -bound, bound)
        # Effective, pre-transposed weight: (W * adj.T).T = adj * W.T -> [din, dout]
        w_eff_t = adj * weight.T
        b = bias.reshape(1, dout)
        # Eval-mode BN running stats / affine params (fresh PyTorch BN defaults).
        gamma = jnp.ones((1, dout), jnp.float32)
        beta = jnp.zeros((1, dout), jnp.float32)
        mean = jnp.zeros((1, dout), jnp.float32)
        var = jnp.ones((1, dout), jnp.float32)
        # Fold eval-mode BN into weight/bias: y = (x@w + b - mean)*scale*g + beta
        scale = gamma * jax.lax.rsqrt(var + EPS)
        w_fold = w_eff_t * scale
        b_fold = (b - mean) * scale + beta
        # Zero-pad to [P, P] / [P]; padded lanes stay exactly 0 -> exact result.
        w_pad = jnp.zeros((P, P), jnp.float32).at[:din, :dout].set(w_fold)
        b_pad = jnp.zeros((P,), jnp.float32).at[:dout].set(b_fold[0])
        w_blocks.append(w_pad)
        b_blocks.append(b_pad)
        layers.append(dict(w_eff_t=w_eff_t, b=b, gamma=gamma, beta=beta,
                           mean=mean, var=var))

    # Classifier Linear(emb, n_classes), zero-padded to [P, P] / [P].
    emb = map_shapes[-1][1]
    key, k_wc, k_bc = jax.random.split(key, 3)
    wc = kaiming_uniform(k_wc, (n_classes, emb), fan_in=emb)   # [2, emb]
    bound = 1.0 / math.sqrt(emb)
    bc = jax.random.uniform(k_bc, (n_classes,), jnp.float32, -bound, bound)
    wc_t = wc.T                                                # [emb, 2]
    w_blocks.append(jnp.zeros((P, P), jnp.float32).at[:emb, :n_classes].set(wc_t))
    b_blocks.append(jnp.zeros((P,), jnp.float32).at[:n_classes].set(bc))

    w_slab = jnp.stack(w_blocks)     # [L+1, P, P]
    b_slab = jnp.stack(b_blocks)     # [L+1, P]
    return dict(layers=layers, w_slab=w_slab, b_slab=b_slab,
                wc_t=wc_t, bc=bc.reshape(1, n_classes))


def sparse_cell_reference(x, params):
    """Pure-JAX reference using the UNFOLDED BN formulation at real dims."""
    h = x
    for lyr in params["layers"]:
        y = h @ lyr["w_eff_t"] + lyr["b"]
        y = (y - lyr["mean"]) * jax.lax.rsqrt(lyr["var"] + EPS) * lyr["gamma"] \
            + lyr["beta"]
        h = jnp.maximum(y, 0.0)
    return h @ params["wc_t"] + params["bc"]


# ---------------------------------- Main ------------------------------------ #

if __name__ == "__main__":
    key = jax.random.PRNGKey(0)
    key, k_x, k_p = jax.random.split(key, 3)

    # maps: adj1 [32 -> 64], adj2 [64 -> 32]  (like SparseCell(maps=[m1, m2], drop_p))
    map_shapes = [(32, 64), (64, 32)]
    batch = 8
    x = jax.random.normal(k_x, (batch, map_shapes[0][0]), jnp.float32)

    params = build_params(k_p, map_shapes, n_classes=2)

    logits = sparse_cell_forward(x, params, n_classes=2)
    logits = jax.block_until_ready(logits)

    ref = sparse_cell_reference(x, params)
    assert logits.shape == (batch, 2)
    assert jnp.allclose(logits, ref, atol=1e-4, rtol=1e-4), "mismatch vs reference"

    print("KERNEL_OK")
</pallas_src>

<mosaic_0001>
module attributes {stable_mosaic.version = 11 : i64} {
  func.func @kernel(%arg0: memref<8x128xf32, #tpu.memory_space<vmem>>, %arg1: memref<3x128x128xf32, #tpu.memory_space<vmem>>, %arg2: memref<3x128xf32, #tpu.memory_space<vmem>>, %arg3: memref<8x128xf32, #tpu.memory_space<vmem>>) attributes {dimension_semantics = [], scalar_prefetch = 0 : i64, scratch_operands = 0 : i64, tpu.core_type = #tpu.core_type<tc>} {
    %c0 = arith.constant 0 : index
    %c0_0 = arith.constant 0 : index
    %0 = vector.load %arg0[%c0, %c0_0] : memref<8x128xf32, #tpu.memory_space<vmem>>, vector<8x128xf32>
    %c0_1 = arith.constant 0 : index
    %c0_2 = arith.constant 0 : index
    %c0_3 = arith.constant 0 : index
    %1 = vector.load %arg1[%c0_1, %c0_2, %c0_3] : memref<3x128x128xf32, #tpu.memory_space<vmem>>, vector<1x128x128xf32>
    %2 = vector.shape_cast %1 : vector<1x128x128xf32> to vector<128x128xf32>
    %c0_4 = arith.constant 0 : index
    %c0_5 = arith.constant 0 : index
    %3 = vector.load %arg2[%c0_4, %c0_5] : memref<3x128xf32, #tpu.memory_space<vmem>>, vector<1x128xf32>
    %cst = arith.constant dense<0.000000e+00> : vector<8x128xf32>
    %4 = tpu.matmul %0, %2, %cst {dimension_numbers = #tpu.dot_dimension_numbers<[1], [0], [0], [1], [0, 0, 1, 1], [], []>} : vector<8x128xf32>, vector<128x128xf32>, vector<8x128xf32> -> vector<8x128xf32>
    %5 = vector.broadcast %3 : vector<1x128xf32> to vector<8x128xf32>
    %6 = arith.addf %4, %5 : vector<8x128xf32>
    %cst_6 = arith.constant 0.000000e+00 : f32
    %7 = vector.broadcast %cst_6 : f32 to vector<8x128xf32>
    %8 = arith.maximumf %6, %7 : vector<8x128xf32>
    %c1 = arith.constant 1 : index
    %c0_7 = arith.constant 0 : index
    %c0_8 = arith.constant 0 : index
    %9 = vector.load %arg1[%c1, %c0_7, %c0_8] : memref<3x128x128xf32, #tpu.memory_space<vmem>>, vector<1x128x128xf32>
    %10 = vector.shape_cast %9 : vector<1x128x128xf32> to vector<128x128xf32>
    %c1_9 = arith.constant 1 : index
    %c0_10 = arith.constant 0 : index
    %11 = vector.load %arg2[%c1_9, %c0_10] : memref<3x128xf32, #tpu.memory_space<vmem>>, vector<1x128xf32>
    %cst_11 = arith.constant dense<0.000000e+00> : vector<8x128xf32>
    %12 = tpu.matmul %8, %10, %cst_11 {dimension_numbers = #tpu.dot_dimension_numbers<[1], [0], [0], [1], [0, 0, 1, 1], [], []>} : vector<8x128xf32>, vector<128x128xf32>, vector<8x128xf32> -> vector<8x128xf32>
    %13 = vector.broadcast %11 : vector<1x128xf32> to vector<8x128xf32>
    %14 = arith.addf %12, %13 : vector<8x128xf32>
    %cst_12 = arith.constant 0.000000e+00 : f32
    %15 = vector.broadcast %cst_12 : f32 to vector<8x128xf32>
    %16 = arith.maximumf %14, %15 : vector<8x128xf32>
    %c2 = arith.constant 2 : index
    %c0_13 = arith.constant 0 : index
    %c0_14 = arith.constant 0 : index
    %17 = vector.load %arg1[%c2, %c0_13, %c0_14] : memref<3x128x128xf32, #tpu.memory_space<vmem>>, vector<1x128x128xf32>
    %18 = vector.shape_cast %17 : vector<1x128x128xf32> to vector<128x128xf32>
    %c2_15 = arith.constant 2 : index
    %c0_16 = arith.constant 0 : index
    %19 = vector.load %arg2[%c2_15, %c0_16] : memref<3x128xf32, #tpu.memory_space<vmem>>, vector<1x128xf32>
    %cst_17 = arith.constant dense<0.000000e+00> : vector<8x128xf32>
    %20 = tpu.matmul %16, %18, %cst_17 {dimension_numbers = #tpu.dot_dimension_numbers<[1], [0], [0], [1], [0, 0, 1, 1], [], []>} : vector<8x128xf32>, vector<128x128xf32>, vector<8x128xf32> -> vector<8x128xf32>
    %21 = vector.broadcast %19 : vector<1x128xf32> to vector<8x128xf32>
    %22 = arith.addf %20, %21 : vector<8x128xf32>
    %c0_18 = arith.constant 0 : index
    %c0_19 = arith.constant 0 : index
    %23 = vector.load %arg3[%c0_18, %c0_19] : memref<8x128xf32, #tpu.memory_space<vmem>>, vector<8x128xf32>
    tpu.vector_store %arg3[%c0_18, %c0_19], %22 {strides = array<i32>} : memref<8x128xf32, #tpu.memory_space<vmem>>, vector<8x128xf32>,
    return
  }
}

</mosaic_0001>

<bundles_post_ra>
// kernel: tpu_custom_call.1
= control target key start
LH: loop header
LB: loop body
LE: loop exit
PB: predicated region body
PF: predicated region fallthrough
CT: control target
= control target key end

     0   :  { %8 = vsyncpa [#allocation3], 0  ;;  %s694_s0 = inlined_call_operand.hbm [shape: f32[8,128], index: 0, kind: input, shape index: {}]   ;;  %s695_s1 = inlined_call_operand.hbm [shape: f32[3,128,128], index: 1, kind: input, shape index: {}]   ;;  %s696_s2 = inlined_call_operand.hbm [shape: f32[3,128], index: 2, kind: input, shape index: {}]   ;;  %s697_s3 = inlined_call_operand.hbm [shape: f32[8,128], index: 3, kind: output, shape index: {}]  }
   0x1   :  { %9 = vsyncpa [#allocation6], 0 }
   0x2   :  { %10 = vsyncpa [#allocation4], 0  ;;  %s600_s12 = smov [#allocation5]  }
   0x3   :  { %s26_s13 = sshll.u32 %s600_s12, 4  ;;  %s27_s13 = int_to_ptr.vmem [resolvable:$true] %s26_s13 }
   0x4   :  { %s522_s14 = scalar_lea.vmem %s27_s13, 6144  ;;  %p527_p1 = scmp.lt.s32.totalorder %s27_s13, %s27_s13 }
   0x5   :  { %p523_p0 = scmp.ne.s32.totalorder %s27_s13, %s522_s14  ;;  %p528_p2 = scmp.lt.s32.totalorder %s522_s14, %s522_s14 }
   0x7   :  { %p529_p3 = por %p528_p2, %p527_p1 }
   0x9   :  { %p530_p4 = pnand %p529_p3, %p523_p0 }
   0xb   :  { %533 = shalt.err (!%p530_p4)
}
   0xc   :  { %s601_s15 = smov 128   ;;  %s602_s16 = smov 8  }
   0xd   :  { %32 = dma.hbm_to_vmem [thread:$0]  %s695_s1, 6144, %s27_s13, [#allocation6], %s601_s15, %s601_s15, %s602_s16  }
   0xe   :  { %s603_s19 = smov [#allocation2]   ;;  %s604_s21 = smov [#allocation7]  }
   0xf   :  { %s17_s20 = sshll.u32 %s603_s19, 4  ;;  %s39_s22 = sshll.u32 %s604_s21, 4  ;;  %s18_s20 = int_to_ptr.vmem [resolvable:$true] %s17_s20  ;;  %s40_s22 = int_to_ptr.vmem [resolvable:$true] %s39_s22 }
  0x10   :  { %s542_s23 = scalar_lea.vmem %s18_s20, 128  ;;  %p547_p6 = scmp.lt.s32.totalorder %s18_s20, %s18_s20 }
  0x11   :  { %p543_p5 = scmp.ne.s32.totalorder %s18_s20, %s542_s23  ;;  %p548_p7 = scmp.lt.s32.totalorder %s542_s23, %s542_s23 }
  0x13   :  { %p549_p8 = por %p548_p7, %p547_p6 }
  0x15   :  { %p550_p9 = pnand %p549_p8, %p543_p5 }
  0x17   :  { %553 = shalt.err (!%p550_p9)
}
  0x18   :  { %20 = dma.hbm_to_vmem [thread:$0]  %s694_s0, 128, %s18_s20, [#allocation3]  }
  0x19   :  { %s562_s26 = scalar_lea.vmem %s40_s22, 64  ;;  %p567_p11 = scmp.lt.s32.totalorder %s40_s22, %s40_s22 }
  0x1a   :  { %p563_p10 = scmp.ne.s32.totalorder %s40_s22, %s562_s26  ;;  %p568_p12 = scmp.lt.s32.totalorder %s562_s26, %s562_s26 }
  0x1c   :  { %p569_p13 = por %p568_p12, %p567_p11 }
  0x1e   :  { %p570_p0 = pnand %p569_p13, %p563_p10 }
  0x20   :  { %573 = shalt.err (!%p570_p0)
}
  0x21   :  { %42 = dma.hbm_to_vmem [thread:$0]  %s696_s2, 64, %s40_s22, [#allocation6]  }
  0x22   :  { %594 = dma.done.wait [#allocation3], 128  }
  0x23   :  { %595 = vsyncadd [#allocation3], 4294967168 }
  0x24   :  { %596 = dma.done.wait [#allocation6], 6208  }
  0x25   :  { %597 = vsyncadd [#allocation6], 4294961088  ;;  %v605_v0 = vmov 0.0   ;;  %vm606_vm0 = vmmov 0   ;;  %v68_v1 = vld [vmem:[#allocation5 + $0x78] sm:$0xff]  ;;  %v67_v2 = vld [vmem:[#allocation5 + $0x70] sm:$0xff] }
  0x26   :  { %401 = vmatprep.subr.mxu0 %v605_v0  ;;  %433 = vmatprep.mubr.msk.f32.mxu0 %vm606_vm0, %v605_v0  ;;  %v66_v3 = vld [vmem:[#allocation5 + $0x68] sm:$0xff]  ;;  %v65_v4 = vld [vmem:[#allocation5 + $0x60] sm:$0xff]  ;;  %v161_v5 = vld [vmem:[#allocation5 + $0xf8] sm:$0xff]  ;;  %s607_s0 = smov [#allocation8]  }
  0x27   :  { %436 = vmatprep.subr.mxu1 %v605_v0  ;;  %468 = vmatprep.mubr.msk.f32.mxu1 %vm606_vm0, %v605_v0  ;;  %v64_v6 = vld [vmem:[#allocation5 + $0x58] sm:$0xff]  ;;  %v160_v7 = vld [vmem:[#allocation5 + $0xf0] sm:$0xff]  ;;  %v159_v8 = vld [vmem:[#allocation5 + $0xe8] sm:$0xff]  ;;  %s337_s2 = sshll.u32 %s607_s0, 4  ;;  %s338_s2 = int_to_ptr.vmem [resolvable:$true] %s337_s2 }
  0x28   :  { %402 = vmatpush3.msra.mxu0 %v68_v1  ;;  %437 = vmatpush3.msra.mxu1 %v161_v5  ;;  %v63_v9 = vld [vmem:[#allocation5 + $0x50] sm:$0xff]  ;;  %v158_v10 = vld [vmem:[#allocation5 + $0xe0] sm:$0xff]  ;;  %v62_v11 = vld [vmem:[#allocation5 + $0x48] sm:$0xff]  ;;  %s574_s28 = scalar_lea.vmem %s338_s2, 128  ;;  %p579_p2 = scmp.lt.s32.totalorder %s338_s2, %s338_s2 }
  0x29   :  { %403 = vmatprep.subr.mxu0 %v605_v0  ;;  %438 = vmatprep.subr.mxu1 %v605_v0  ;;  %v157_v12 = vld [vmem:[#allocation5 + $0xd8] sm:$0xff]  ;;  %v61_v13 = vld [vmem:[#allocation5 + $0x40] sm:$0xff]  ;;  %v156_v14 = vld [vmem:[#allocation5 + $0xd0] sm:$0xff]  ;;  %p575_p1 = scmp.ne.s32.totalorder %s338_s2, %s574_s28  ;;  %p580_p3 = scmp.lt.s32.totalorder %s574_s28, %s574_s28 }
  0x2a   :  { %404 = vmatpush3.msra.mxu0 %v67_v2  ;;  %439 = vmatpush3.msra.mxu1 %v160_v7  ;;  %v60_v15 = vld [vmem:[#allocation5 + $0x38] sm:$0xff]  ;;  %v155_v16 = vld [vmem:[#allocation5 + $0xc8] sm:$0xff]  ;;  %v59_v17 = vld [vmem:[#allocation5 + $0x30] sm:$0xff] }
  0x2b   :  { %405 = vmatprep.subr.mxu0 %v605_v0  ;;  %440 = vmatprep.subr.mxu1 %v605_v0  ;;  %v154_v18 = vld [vmem:[#allocation5 + $0xc0] sm:$0xff]  ;;  %v58_v19 = vld [vmem:[#allocation5 + $0x28] sm:$0xff]  ;;  %v153_v20 = vld [vmem:[#allocation5 + $0xb8] sm:$0xff]  ;;  %p581_p4 = por %p580_p3, %p579_p2 }
  0x2c   :  { %406 = vmatpush3.msra.mxu0 %v66_v3  ;;  %441 = vmatpush3.msra.mxu1 %v159_v8  ;;  %v57_v21 = vld [vmem:[#allocation5 + $0x20] sm:$0xff]  ;;  %v152_v22 = vld [vmem:[#allocation5 + $0xb0] sm:$0xff]  ;;  %v56_v23 = vld [vmem:[#allocation5 + $0x18] sm:$0xff] }
  0x2d   :  { %407 = vmatprep.subr.mxu0 %v605_v0  ;;  %442 = vmatprep.subr.mxu1 %v605_v0  ;;  %v151_v24 = vld [vmem:[#allocation5 + $0xa8] sm:$0xff]  ;;  %v55_v25 = vld [vmem:[#allocation5 + $0x10] sm:$0xff]  ;;  %v150_v26 = vld [vmem:[#allocation5 + $0xa0] sm:$0xff]  ;;  %p582_p5 = pnand %p581_p4, %p575_p1 }
  0x2e   :  { %408 = vmatpush3.msra.mxu0 %v65_v4  ;;  %443 = vmatpush3.msra.mxu1 %v158_v10  ;;  %v54_v27 = vld [vmem:[#allocation5 + $0x8] sm:$0xff]  ;;  %v149_v28 = vld [vmem:[#allocation5 + $0x98] sm:$0xff]  ;;  %v53_v29 = vld [vmem:[#allocation5] sm:$0xff] }
  0x2f   :  { %409 = vmatprep.subr.mxu0 %v605_v0  ;;  %444 = vmatprep.subr.mxu1 %v605_v0  ;;  %v52_v30 = vld [vmem:[#allocation2] sm:$0xff]  ;;  %v148_v31 = vld [vmem:[#allocation5 + $0x90] sm:$0xff]  ;;  %v147_v32 = vld [vmem:[#allocation5 + $0x88] sm:$0xff] }
  0x30   :  { %410 = vmatpush3.msra.mxu0 %v64_v6  ;;  %445 = vmatpush3.msra.mxu1 %v157_v12  ;;  %v146_v33 = vld [vmem:[#allocation5 + $0x80] sm:$0xff]  ;;  %v254_v34 = vld [vmem:[#allocation5 + $0x178] sm:$0xff]  ;;  %v253_v35 = vld [vmem:[#allocation5 + $0x170] sm:$0xff] }
  0x31   :  { %411 = vmatprep.subr.mxu0 %v605_v0  ;;  %446 = vmatprep.subr.mxu1 %v605_v0  ;;  %v252_v36 = vld [vmem:[#allocation5 + $0x168] sm:$0xff]  ;;  %v251_v37 = vld [vmem:[#allocation5 + $0x160] sm:$0xff]  ;;  %v250_v38 = vld [vmem:[#allocation5 + $0x158] sm:$0xff] }
  0x32   :  { %412 = vmatpush3.msra.mxu0 %v63_v9  ;;  %447 = vmatpush3.msra.mxu1 %v156_v14  ;;  %v249_v39 = vld [vmem:[#allocation5 + $0x150] sm:$0xff]  ;;  %v248_v40 = vld [vmem:[#allocation5 + $0x148] sm:$0xff]  ;;  %v247_v41 = vld [vmem:[#allocation5 + $0x140] sm:$0xff] }
  0x33   :  { %413 = vmatprep.subr.mxu0 %v605_v0  ;;  %448 = vmatprep.subr.mxu1 %v605_v0  ;;  %v246_v42 = vld [vmem:[#allocation5 + $0x138] sm:$0xff]  ;;  %v245_v43 = vld [vmem:[#allocation5 + $0x130] sm:$0xff]  ;;  %v244_v44 = vld [vmem:[#allocation5 + $0x128] sm:$0xff] }
  0x34   :  { %414 = vmatpush3.msra.mxu0 %v62_v11  ;;  %449 = vmatpush3.msra.mxu1 %v155_v16  ;;  %v243_v45 = vld [vmem:[#allocation5 + $0x120] sm:$0xff]  ;;  %v242_v46 = vld [vmem:[#allocation5 + $0x118] sm:$0xff]  ;;  %v241_v52 = vld [vmem:[#allocation5 + $0x110] sm:$0xff] }
  0x35   :  { %415 = vmatprep.subr.mxu0 %v605_v0  ;;  %450 = vmatprep.subr.mxu1 %v605_v0  ;;  %v347_v47 = vld [vmem:[#allocation7] ss:$0 sm:$0xff]  ;;  %v240_v53 = vld [vmem:[#allocation5 + $0x108] sm:$0xff]  ;;  %v348_v55 = vld [vmem:[#allocation7 + $0x1] ss:$0 sm:$0xff] }
  0x36   :  { %416 = vmatpush3.msra.mxu0 %v61_v13  ;;  %451 = vmatpush3.msra.mxu1 %v154_v18  ;;  %v239_v54 = vld [vmem:[#allocation5 + $0x100] sm:$0xff] }
  0x37   :  { %417 = vmatprep.subr.mxu0 %v605_v0  ;;  %452 = vmatprep.subr.mxu1 %v605_v0  ;;  %v349_v60 = vld [vmem:[#allocation7 + $0x2] ss:$0 sm:$0xff] }
  0x38   :  { %418 = vmatpush3.msra.mxu0 %v60_v15  ;;  %453 = vmatpush3.msra.mxu1 %v153_v20 }
  0x39   :  { %419 = vmatprep.subr.mxu0 %v605_v0  ;;  %454 = vmatprep.subr.mxu1 %v605_v0 }
  0x3a   :  { %420 = vmatpush3.msra.mxu0 %v59_v17  ;;  %455 = vmatpush3.msra.mxu1 %v152_v22 }
  0x3b   :  { %421 = vmatprep.subr.mxu0 %v605_v0  ;;  %456 = vmatprep.subr.mxu1 %v605_v0 }
  0x3c   :  { %422 = vmatpush3.msra.mxu0 %v58_v19  ;;  %457 = vmatpush3.msra.mxu1 %v151_v24 }
  0x3d   :  { %423 = vmatprep.subr.mxu0 %v605_v0  ;;  %458 = vmatprep.subr.mxu1 %v605_v0 }
  0x3e   :  { %424 = vmatpush3.msra.mxu0 %v57_v21  ;;  %459 = vmatpush3.msra.mxu1 %v150_v26 }
  0x3f   :  { %425 = vmatprep.subr.mxu0 %v605_v0  ;;  %460 = vmatprep.subr.mxu1 %v605_v0 }
  0x40   :  { %426 = vmatpush3.msra.mxu0 %v56_v23  ;;  %461 = vmatpush3.msra.mxu1 %v149_v28 }
  0x41   :  { %427 = vmatprep.subr.mxu0 %v605_v0  ;;  %462 = vmatprep.subr.mxu1 %v605_v0 }
  0x42   :  { %428 = vmatpush3.msra.mxu0 %v55_v25  ;;  %463 = vmatpush3.msra.mxu1 %v148_v31 }
  0x43   :  { %429 = vmatprep.subr.mxu0 %v605_v0  ;;  %464 = vmatprep.subr.mxu1 %v605_v0 }
  0x44   :  { %430 = vmatpush3.msra.mxu0 %v54_v27  ;;  %465 = vmatpush3.msra.mxu1 %v147_v32 }
  0x45   :  { %431 = vmatprep.subr.mxu0 %v605_v0  ;;  %466 = vmatprep.subr.mxu1 %v605_v0 }
  0x46   :  { %432 = vmatpush3.msra.mxu0 %v53_v29  ;;  %467 = vmatpush3.msra.mxu1 %v146_v33 }
  0x47   :  { %434 = vmatmul.mubr.f32.vlgmr.msra.gmra.mxu0 %v52_v30  ;;  %471 = vmatprep.subr.mxu0 %v605_v0 }
  0x48   :  { %503 = vmatprep.mubr.msk.f32.mxu0 %vm606_vm0, %v605_v0  ;;  %472 = vmatpush3.msra.mxu0 %v254_v34 }
  0x49   :  { %473 = vmatprep.subr.mxu0 %v605_v0 }
  0x4a   :  { %474 = vmatpush3.msra.mxu0 %v253_v35 }
  0x4b   :  { %475 = vmatprep.subr.mxu0 %v605_v0 }
  0x4c   :  { %476 = vmatpush3.msra.mxu0 %v252_v36 }
  0x4d   :  { %477 = vmatprep.subr.mxu0 %v605_v0 }
  0x4e   :  { %478 = vmatpush3.msra.mxu0 %v251_v37 }
  0x4f   :  { %479 = vmatprep.subr.mxu0 %v605_v0 }
  0x50   :  { %480 = vmatpush3.msra.mxu0 %v250_v38 }
  0x51   :  { %481 = vmatprep.subr.mxu0 %v605_v0 }
  0x52   :  { %482 = vmatpush3.msra.mxu0 %v249_v39 }
  0x53   :  { %483 = vmatprep.subr.mxu0 %v605_v0 }
  0x54   :  { %484 = vmatpush3.msra.mxu0 %v248_v40 }
  0x55   :  { %485 = vmatprep.subr.mxu0 %v605_v0 }
  0x56   :  { %486 = vmatpush3.msra.mxu0 %v247_v41 }
  0x57   :  { %487 = vmatprep.subr.mxu0 %v605_v0 }
  0x58   :  { %488 = vmatpush3.msra.mxu0 %v246_v42 }
  0x59   :  { %489 = vmatprep.subr.mxu0 %v605_v0 }
  0x5a   :  { %490 = vmatpush3.msra.mxu0 %v245_v43 }
  0x5b   :  { %491 = vmatprep.subr.mxu0 %v605_v0 }
  0x5c   :  { %492 = vmatpush3.msra.mxu0 %v244_v44 }
  0x5d   :  { %493 = vmatprep.subr.mxu0 %v605_v0 }
  0x5e   :  { %494 = vmatpush3.msra.mxu0 %v243_v45 }
  0x5f   :  { %495 = vmatprep.subr.mxu0 %v605_v0 }
  0x60   :  { %496 = vmatpush3.msra.mxu0 %v242_v46 }
  0x61   :  { %497 = vmatprep.subr.mxu0 %v605_v0 }
  0x62   :  { %498 = vmatpush3.msra.mxu0 %v241_v52 }
  0x63   :  { %499 = vmatprep.subr.mxu0 %v605_v0 }
  0x64   :  { %500 = vmatpush3.msra.mxu0 %v240_v53 }
  0x65   :  { %501 = vmatprep.subr.mxu0 %v605_v0 }
  0x66   :  { %502 = vmatpush3.msra.mxu0 %v239_v54 }
 0x107   :  { %v140_v48 = vpop.f32.mrf.mxu0 }
 0x108   :  { %v141_v49 = vadd.f32 %v347_v47, %v140_v48 }
 0x109   :  { %v435_v50 = vpop.f32.mrf.mxu0 }
 0x10a   :  { %v144_v51 = vmax.f32 %v141_v49, 0.0 }
 0x10c   :  { %469 = vmatmul.mubr.f32.vlgmr.msra.gmra.mxu1 %v144_v51 }
 0x1cc   :  { %v233_v56 = vpop.f32.mrf.mxu1 }
 0x1cd   :  { %v234_v57 = vadd.f32 %v348_v55, %v233_v56 }
 0x1ce   :  { %v470_v58 = vpop.f32.mrf.mxu1 }
 0x1cf   :  { %v237_v59 = vmax.f32 %v234_v57, 0.0 }
 0x1d1   :  { %504 = vmatmul.mubr.f32.vlgmr.msra.gmra.mxu0 %v237_v59 }
 0x291   :  { %v326_v61 = vpop.f32.mrf.mxu0 }
 0x292   :  { %v327_v62 = vadd.f32 %v349_v60, %v326_v61 }
 0x293   :  { %v505_v63 = vpop.f32.mrf.mxu0 }
 0x294   :  { %330 = vst [vmem:[#allocation8] sm:$0xff] %v327_v62 }
 0x295   :  { %585 = shalt.err (!%p582_p5)
}
 0x296   :  { %340 = dma.vmem_to_hbm [thread:$0]  %s338_s2, 128, %s697_s3, [#allocation4]  }
 0x297   :  { %598 = dma.done.wait [#allocation4], 128  }
 0x298   :  { %599 = vsyncadd [#allocation4], 4294967168 }
 0x299   :  { %344 = vsyncpa [#allocation3], 1 }
 0x29a   :  { %345 = vsyncpa [#allocation6], 1 }
 0x29b   :  { %346 = vsyncpa [#allocation4], 1 }

</bundles_post_ra>
